<compile_context>
chip_gen: v7x
topology: tpu7x:2x2x1
jax: 0.10.0
libtpu: 0.0.40
codegen_flags: <defaults>
</compile_context>

<pallas_src>
import math
import functools

import jax
import jax.numpy as jnp
from jax.experimental import pallas as pl
from jax.experimental.pallas import tpu as pltpu


# ----------------------------- kernel ---------------------------------------
def _block_kernel(x_ref,
                  ln1g_ref, ln1b_ref,
                  wqkv_ref, bqkv_ref,
                  wp_ref, bp_ref,
                  ln2g_ref, ln2b_ref,
                  w1_ref, b1_ref, w2_ref, b2_ref,
                  o_ref,
                  *, n_heads, seq_len, approx_recip):
    M, C = x_ref.shape                 # M = block_b * T rows per grid step
    T = seq_len
    Bb = M // T
    N = n_heads
    D = C // N
    H = Bb * N                         # total heads in this block
    eps = 1e-5                         # PyTorch LayerNorm default
    cdt = wqkv_ref.dtype               # matmul operand dtype (bf16 fast / f32 exact)

    x = x_ref[...].astype(jnp.float32)                                    # (M, C)

    def layernorm(z, g_ref, b_ref):
        mu = jnp.mean(z, axis=-1, keepdims=True)
        zc = z - mu
        var = jnp.mean(zc * zc, axis=-1, keepdims=True)
        return zc * jax.lax.rsqrt(var + eps) * g_ref[0, :] + b_ref[0, :]

    # ---------------- attention branch ----------------
    h1 = layernorm(x, ln1g_ref, ln1b_ref)                                 # (M, C) f32

    # Fused QKV projection: one MXU pass, f32 accumulation.  1/sqrt(D) is
    # already folded into the Q columns of wqkv/bqkv by the wrapper.
    qkv = jnp.dot(h1.astype(cdt), wqkv_ref[...],
                  preferred_element_type=jnp.float32) + bqkv_ref[0, :]    # (M, 3C) f32

    def split_heads(z_f32):
        # (M, C) -> (Bb, T, N, D) -> (Bb, N, T, D) -> (H, T, D); one batched
        # relayout for all Bb*N heads (no per-head transposes).
        z = z_f32.reshape(Bb, T, N, D)
        z = jnp.transpose(z, (0, 2, 1, 3))
        return z.reshape(H, T, D).astype(cdt)

    qh = split_heads(qkv[:, 0 * C:1 * C])                                 # (H, T, D)
    kh = split_heads(qkv[:, 1 * C:2 * C])
    vh = split_heads(qkv[:, 2 * C:3 * C])

    row = jax.lax.broadcasted_iota(jnp.int32, (T, T), 0)
    col = jax.lax.broadcasted_iota(jnp.int32, (T, T), 1)
    causal = (col <= row)[None, :, :]                                     # (1, T, T)

    # One head-batched score matmul over all H heads.
    s = jnp.einsum('htd,hsd->hts', qh, kh,
                   preferred_element_type=jnp.float32)                    # (H, T, T) f32
    # -inf is safe: the diagonal is always unmasked so every row has a finite
    # max.  (If T were ever padded past the true length, use a large finite
    # negative instead.)
    s = jnp.where(causal, s, -jnp.inf)

    # Hand-rolled softmax; reciprocal goes to the EUP slot on the fast path.
    smax = jnp.max(s, axis=-1, keepdims=True)
    e = jnp.exp(s - smax)
    denom = jnp.sum(e, axis=-1, keepdims=True)
    p = e * pl.reciprocal(denom, approx=approx_recip)                     # (H, T, T) f32

    o = jnp.einsum('hts,hsd->htd', p.astype(cdt), vh,
                   preferred_element_type=jnp.float32)                    # (H, T, D) f32
    attn = jnp.transpose(o.reshape(Bb, N, T, D), (0, 2, 1, 3)).reshape(M, C)

    attn = jnp.dot(attn.astype(cdt), wp_ref[...],
                   preferred_element_type=jnp.float32) + bp_ref[0, :]
    x = x + attn                                                          # residual 1

    # ---------------- MLP branch ----------------
    h2 = layernorm(x, ln2g_ref, ln2b_ref)                                 # (M, C) f32
    m = jnp.dot(h2.astype(cdt), w1_ref[...],
                preferred_element_type=jnp.float32) + b1_ref[0, :]        # (M, 4C) f32
    # exact (erf-based) GELU, matching nn.GELU default
    m = 0.5 * m * (1.0 + jax.lax.erf(m * (1.0 / math.sqrt(2.0))))
    m = jnp.dot(m.astype(cdt), w2_ref[...],
                preferred_element_type=jnp.float32) + b2_ref[0, :]        # (M, C) f32
    x = x + m                                                             # residual 2

    o_ref[...] = x.astype(o_ref.dtype)


# ----------------------------- wrapper ---------------------------------------
def _pick_block_b(B, T, target_m=256):
    """Largest divisor of B such that block_b*T is sublane-aligned and
    block_b*T <= target_m (MXU row fill), preferring grid >= 2 so the
    'parallel' batch axis can shard across v7x's two TensorCores."""
    divisors = [d for d in range(1, B + 1) if B % d == 0]
    legal = [d for d in divisors if (d * T) % 8 == 0 or d == B]
    pref = [d for d in legal if B // d >= 2] or legal
    under = [d for d in pref if d * T <= target_m]
    return max(under) if under else min(pref)


def block_forward(x, params, *, n_heads, compute_dtype=jnp.bfloat16, block_b=None):
    """x: (B, T, C) float32.  params: dict of 2-D arrays (see init_params).

    compute_dtype: dtype of matmul operands (accumulation is always f32).
    """
    B, T, C = x.shape
    D = C // n_heads
    if block_b is None:
        block_b = _pick_block_b(B, T)
    assert B % block_b == 0
    cdt = compute_dtype
    inv_sqrt_d = 1.0 / math.sqrt(D)

    # Fused QKV weight (C, 3C) / bias (1, 3C); 1/sqrt(D) folded into the Q
    # columns (one-time weight transform).  Weights in compute dtype; biases
    # and LayerNorm params stay f32 (added after f32-accumulated dots).
    wqkv = jnp.concatenate(
        [params["wq"] * inv_sqrt_d, params["wk"], params["wv"]], axis=1).astype(cdt)
    bqkv = jnp.concatenate(
        [params["bq"] * inv_sqrt_d, params["bk"], params["bv"]], axis=1).astype(jnp.float32)

    param_list = [
        params["ln1_g"].astype(jnp.float32), params["ln1_b"].astype(jnp.float32),
        wqkv, bqkv,
        params["wp"].astype(cdt), params["bp"].astype(jnp.float32),
        params["ln2_g"].astype(jnp.float32), params["ln2_b"].astype(jnp.float32),
        params["w1"].astype(cdt), params["b1"].astype(jnp.float32),
        params["w2"].astype(cdt), params["b2"].astype(jnp.float32),
    ]

    # Flatten activations wrapper-side: kernel sees plain (block_b*T, C) slabs.
    M_total = B * T
    Mb = block_b * T
    x2d = x.reshape(M_total, C)

    x_spec = pl.BlockSpec((Mb, C), lambda b: (b, 0))
    # Parameters: full-array blocks, constant index map (resident across grid).
    param_specs = [pl.BlockSpec(p.shape, lambda b: (0, 0)) for p in param_list]

    out2d = pl.pallas_call(
        functools.partial(_block_kernel, n_heads=n_heads, seq_len=T,
                          approx_recip=(compute_dtype != jnp.float32)),
        out_shape=jax.ShapeDtypeStruct((M_total, C), x.dtype),
        grid_spec=pltpu.PrefetchScalarGridSpec(
            num_scalar_prefetch=0,
            grid=(B // block_b,),
            in_specs=[x_spec] + param_specs,
            out_specs=pl.BlockSpec((Mb, C), lambda b: (b, 0)),
        ),
        compiler_params=pltpu.CompilerParams(
            dimension_semantics=("parallel",),
            # vmem_limit_bytes intentionally not set: working set is tiny and
            # requesting all of v7x's 64 MiB leaves no Mosaic headroom.
        ),
    )(x2d, *param_list)
    return out2d.reshape(B, T, C)


# ----------------------------- params / reference ----------------------------
def init_params(key, h_dim):
    ks = jax.random.split(key, 6)
    scale = 0.02

    def lin(k, n_in, n_out):
        w = scale * jax.random.normal(k, (n_in, n_out), jnp.float32)   # (in, out)
        b = jnp.zeros((1, n_out), jnp.float32)
        return w, b

    wq, bq = lin(ks[0], h_dim, h_dim)
    wk, bk = lin(ks[1], h_dim, h_dim)
    wv, bv = lin(ks[2], h_dim, h_dim)
    wp, bp = lin(ks[3], h_dim, h_dim)
    w1, b1 = lin(ks[4], h_dim, 4 * h_dim)
    w2, b2 = lin(ks[5], 4 * h_dim, h_dim)
    return dict(
        ln1_g=jnp.ones((1, h_dim), jnp.float32), ln1_b=jnp.zeros((1, h_dim), jnp.float32),
        ln2_g=jnp.ones((1, h_dim), jnp.float32), ln2_b=jnp.zeros((1, h_dim), jnp.float32),
        wq=wq, bq=bq, wk=wk, bk=bk, wv=wv, bv=bv, wp=wp, bp=bp,
        w1=w1, b1=b1, w2=w2, b2=b2,
    )


def block_reference(x, p, *, n_heads):
    """Pure-JAX reference (mirrors the PyTorch forward, eval mode)."""
    B, T, C = x.shape
    D = C // n_heads

    def ln(z, g, b):
        mu = jnp.mean(z, axis=-1, keepdims=True)
        var = jnp.mean((z - mu) ** 2, axis=-1, keepdims=True)
        return (z - mu) / jnp.sqrt(var + 1e-5) * g[0] + b[0]

    h1 = ln(x, p["ln1_g"], p["ln1_b"])
    q = (h1 @ p["wq"] + p["bq"][0]).reshape(B, T, n_heads, D).transpose(0, 2, 1, 3)
    k = (h1 @ p["wk"] + p["bk"][0]).reshape(B, T, n_heads, D).transpose(0, 2, 1, 3)
    v = (h1 @ p["wv"] + p["bv"][0]).reshape(B, T, n_heads, D).transpose(0, 2, 1, 3)
    w = (q @ k.transpose(0, 1, 3, 2)) / math.sqrt(D)
    mask = jnp.tril(jnp.ones((T, T), bool))
    w = jnp.where(mask[None, None], w, -jnp.inf)
    a = jax.nn.softmax(w, axis=-1) @ v
    a = a.transpose(0, 2, 1, 3).reshape(B, T, C)
    x = x + (a @ p["wp"] + p["bp"][0])

    h2 = ln(x, p["ln2_g"], p["ln2_b"])
    m = h2 @ p["w1"] + p["b1"][0]
    m = 0.5 * m * (1.0 + jax.lax.erf(m / math.sqrt(2.0)))
    m = m @ p["w2"] + p["b2"][0]
    return x + m


# ----------------------------- main ------------------------------------------
if __name__ == "__main__":
    B, T, H_DIM, N_HEADS = 2, 8, 32, 2          # T == max_T
    key = jax.random.PRNGKey(0)
    kx, kp = jax.random.split(key)
    x = jax.random.normal(kx, (B, T, H_DIM), jnp.float32)
    params = init_params(kp, H_DIM)

    ref = block_reference(x, params, n_heads=N_HEADS)

    # Exact-precision path (f32 matmul operands, exact reciprocal): tight parity.
    out_f32 = jax.block_until_ready(
        block_forward(x, params, n_heads=N_HEADS, compute_dtype=jnp.float32))
    assert out_f32.shape == (B, T, H_DIM)
    assert jnp.allclose(out_f32, ref, atol=1e-4, rtol=1e-4), "f32 mismatch vs reference"

    # Fast path (bf16 matmul operands, f32 accumulation, approx EUP reciprocal).
    out_bf16 = jax.block_until_ready(
        block_forward(x, params, n_heads=N_HEADS, compute_dtype=jnp.bfloat16))
    assert out_bf16.shape == (B, T, H_DIM)
    assert jnp.allclose(out_bf16, ref, atol=3e-2, rtol=3e-2), "bf16 mismatch vs reference"

    print("KERNEL_OK")
</pallas_src>

<mosaic_0001>
module attributes {stable_mosaic.version = 11 : i64} {
  func.func @_block_kernel(%arg0: i32, %arg1: memref<8x32xf32, #tpu.memory_space<vmem>>, %arg2: memref<1x32xf32, #tpu.memory_space<vmem>>, %arg3: memref<1x32xf32, #tpu.memory_space<vmem>>, %arg4: memref<32x96xf32, #tpu.memory_space<vmem>>, %arg5: memref<1x96xf32, #tpu.memory_space<vmem>>, %arg6: memref<32x32xf32, #tpu.memory_space<vmem>>, %arg7: memref<1x32xf32, #tpu.memory_space<vmem>>, %arg8: memref<1x32xf32, #tpu.memory_space<vmem>>, %arg9: memref<1x32xf32, #tpu.memory_space<vmem>>, %arg10: memref<32x128xf32, #tpu.memory_space<vmem>>, %arg11: memref<1x128xf32, #tpu.memory_space<vmem>>, %arg12: memref<128x32xf32, #tpu.memory_space<vmem>>, %arg13: memref<1x32xf32, #tpu.memory_space<vmem>>, %arg14: memref<8x32xf32, #tpu.memory_space<vmem>>) attributes {dimension_semantics = [#tpu.dimension_semantics<parallel>], iteration_bounds = array<i64: 2>, scalar_prefetch = 0 : i64, scratch_operands = 0 : i64, tpu.core_type = #tpu.core_type<tc>, window_params = [{transform_indices = @transform_0, window_bounds = array<i64: 8, 32>}, {pipeline_mode = #tpu.pipeline_mode<synchronous>, transform_indices = @transform_1, window_bounds = array<i64: 1, 32>}, {pipeline_mode = #tpu.pipeline_mode<synchronous>, transform_indices = @transform_2, window_bounds = array<i64: 1, 32>}, {pipeline_mode = #tpu.pipeline_mode<synchronous>, transform_indices = @transform_3, window_bounds = array<i64: 32, 96>}, {pipeline_mode = #tpu.pipeline_mode<synchronous>, transform_indices = @transform_4, window_bounds = array<i64: 1, 96>}, {pipeline_mode = #tpu.pipeline_mode<synchronous>, transform_indices = @transform_5, window_bounds = array<i64: 32, 32>}, {pipeline_mode = #tpu.pipeline_mode<synchronous>, transform_indices = @transform_6, window_bounds = array<i64: 1, 32>}, {pipeline_mode = #tpu.pipeline_mode<synchronous>, transform_indices = @transform_7, window_bounds = array<i64: 1, 32>}, {pipeline_mode = #tpu.pipeline_mode<synchronous>, transform_indices = @transform_8, window_bounds = array<i64: 1, 32>}, {pipeline_mode = #tpu.pipeline_mode<synchronous>, transform_indices = @transform_9, window_bounds = array<i64: 32, 128>}, {pipeline_mode = #tpu.pipeline_mode<synchronous>, transform_indices = @transform_10, window_bounds = array<i64: 1, 128>}, {pipeline_mode = #tpu.pipeline_mode<synchronous>, transform_indices = @transform_11, window_bounds = array<i64: 128, 32>}, {pipeline_mode = #tpu.pipeline_mode<synchronous>, transform_indices = @transform_12, window_bounds = array<i64: 1, 32>}, {transform_indices = @transform_13, window_bounds = array<i64: 8, 32>}]} {
    %c0 = arith.constant 0 : index
    %c0_0 = arith.constant 0 : index
    %0 = vector.load %arg1[%c0, %c0_0] : memref<8x32xf32, #tpu.memory_space<vmem>>, vector<8x32xf32>
    %cst = arith.constant dense<0.000000e+00> : vector<8xf32>
    %1 = vector.multi_reduction <add>, %0, %cst [1] : vector<8x32xf32> to vector<8xf32>
    %2 = vector.shape_cast %1 : vector<8xf32> to vector<8x1xf32>
    %cst_1 = arith.constant 3.200000e+01 : f32
    %3 = vector.broadcast %cst_1 : f32 to vector<8x1xf32>
    %4 = arith.divf %2, %3 : vector<8x1xf32>
    %5 = vector.broadcast %4 : vector<8x1xf32> to vector<8x32xf32>
    %6 = arith.subf %0, %5 : vector<8x32xf32>
    %7 = arith.mulf %6, %6 : vector<8x32xf32>
    %cst_2 = arith.constant dense<0.000000e+00> : vector<8xf32>
    %8 = vector.multi_reduction <add>, %7, %cst_2 [1] : vector<8x32xf32> to vector<8xf32>
    %9 = vector.shape_cast %8 : vector<8xf32> to vector<8x1xf32>
    %cst_3 = arith.constant 3.200000e+01 : f32
    %10 = vector.broadcast %cst_3 : f32 to vector<8x1xf32>
    %11 = arith.divf %9, %10 : vector<8x1xf32>
    %cst_4 = arith.constant 9.99999974E-6 : f32
    %12 = vector.broadcast %cst_4 : f32 to vector<8x1xf32>
    %13 = arith.addf %11, %12 : vector<8x1xf32>
    %14 = math.rsqrt %13 : vector<8x1xf32>
    %15 = vector.broadcast %14 : vector<8x1xf32> to vector<8x32xf32>
    %16 = arith.mulf %6, %15 : vector<8x32xf32>
    %c0_5 = arith.constant 0 : index
    %c0_6 = arith.constant 0 : index
    %17 = vector.load %arg2[%c0_5, %c0_6] : memref<1x32xf32, #tpu.memory_space<vmem>>, vector<1x32xf32>
    %18 = vector.shape_cast %17 : vector<1x32xf32> to vector<32xf32>
    %19 = vector.shape_cast %18 : vector<32xf32> to vector<1x32xf32>
    %20 = vector.broadcast %19 : vector<1x32xf32> to vector<8x32xf32>
    %21 = arith.mulf %16, %20 : vector<8x32xf32>
    %c0_7 = arith.constant 0 : index
    %c0_8 = arith.constant 0 : index
    %22 = vector.load %arg3[%c0_7, %c0_8] : memref<1x32xf32, #tpu.memory_space<vmem>>, vector<1x32xf32>
    %23 = vector.shape_cast %22 : vector<1x32xf32> to vector<32xf32>
    %24 = vector.shape_cast %23 : vector<32xf32> to vector<1x32xf32>
    %25 = vector.broadcast %24 : vector<1x32xf32> to vector<8x32xf32>
    %26 = arith.addf %21, %25 : vector<8x32xf32>
    %c0_9 = arith.constant 0 : index
    %c0_10 = arith.constant 0 : index
    %27 = vector.load %arg4[%c0_9, %c0_10] : memref<32x96xf32, #tpu.memory_space<vmem>>, vector<32x96xf32>
    %cst_11 = arith.constant dense<0.000000e+00> : vector<8x96xf32>
    %28 = tpu.matmul %26, %27, %cst_11 {dimension_numbers = #tpu.dot_dimension_numbers<[1], [0], [0], [1], [0, 0, 1, 1], [], []>} : vector<8x32xf32>, vector<32x96xf32>, vector<8x96xf32> -> vector<8x96xf32>
    %c0_12 = arith.constant 0 : index
    %c0_13 = arith.constant 0 : index
    %29 = vector.load %arg5[%c0_12, %c0_13] : memref<1x96xf32, #tpu.memory_space<vmem>>, vector<1x96xf32>
    %30 = vector.shape_cast %29 : vector<1x96xf32> to vector<96xf32>
    %31 = vector.shape_cast %30 : vector<96xf32> to vector<1x96xf32>
    %32 = vector.broadcast %31 : vector<1x96xf32> to vector<8x96xf32>
    %33 = arith.addf %28, %32 : vector<8x96xf32>
    %34 = vector.extract_strided_slice %33 {offsets = [0, 0], sizes = [8, 32], strides = [1, 1]} : vector<8x96xf32> to vector<8x32xf32>
    %35 = vector.shape_cast %34 : vector<8x32xf32> to vector<1x8x2x16xf32>
    %36 = tpu.transpose %35, [0, 2, 1, 3] : vector<1x8x2x16xf32> -> vector<1x2x8x16xf32>
    %37 = vector.shape_cast %36 : vector<1x2x8x16xf32> to vector<2x8x16xf32>
    %38 = vector.extract_strided_slice %33 {offsets = [0, 32], sizes = [8, 32], strides = [1, 1]} : vector<8x96xf32> to vector<8x32xf32>
    %39 = vector.shape_cast %38 : vector<8x32xf32> to vector<1x8x2x16xf32>
    %40 = tpu.transpose %39, [0, 2, 1, 3] : vector<1x8x2x16xf32> -> vector<1x2x8x16xf32>
    %41 = vector.shape_cast %40 : vector<1x2x8x16xf32> to vector<2x8x16xf32>
    %42 = vector.extract_strided_slice %33 {offsets = [0, 64], sizes = [8, 32], strides = [1, 1]} : vector<8x96xf32> to vector<8x32xf32>
    %43 = vector.shape_cast %42 : vector<8x32xf32> to vector<1x8x2x16xf32>
    %44 = tpu.transpose %43, [0, 2, 1, 3] : vector<1x8x2x16xf32> -> vector<1x2x8x16xf32>
    %45 = vector.shape_cast %44 : vector<1x2x8x16xf32> to vector<2x8x16xf32>
    %46 = tpu.iota {dimensions = array<i32: 0>} : vector<8x8xi32>
    %47 = tpu.iota {dimensions = array<i32: 1>} : vector<8x8xi32>
    %48 = arith.cmpi sle, %47, %46 : vector<8x8xi32>
    %49 = vector.shape_cast %48 : vector<8x8xi1> to vector<1x8x8xi1>
    "tpu.trace_start"() <{level = 10 : i32, message = "htd,hsd->hts"}> : () -> ()
    %cst_14 = arith.constant dense<0.000000e+00> : vector<2x8x8xf32>
    %50 = tpu.matmul %37, %41, %cst_14 {dimension_numbers = #tpu.dot_dimension_numbers<[2], [2], [1], [1], [0, 0, 0, 1, 1, 1], [0], [0]>} : vector<2x8x16xf32>, vector<2x8x16xf32>, vector<2x8x8xf32> -> vector<2x8x8xf32>
    %cst_15 = arith.constant 0xFF800000 : f32
    "tpu.trace_stop"() : () -> ()
    %51 = vector.shape_cast %49 : vector<1x8x8xi1> to vector<1x8x8xi1>
    %52 = vector.broadcast %51 : vector<1x8x8xi1> to vector<2x8x8xi1>
    %53 = vector.broadcast %cst_15 : f32 to vector<2x8x8xf32>
    %54 = arith.select %52, %50, %53 : vector<2x8x8xi1>, vector<2x8x8xf32>
    %cst_16 = arith.constant dense<0xFF800000> : vector<2x8xf32>
    %55 = vector.multi_reduction <maximumf>, %54, %cst_16 [2] : vector<2x8x8xf32> to vector<2x8xf32>
    %56 = vector.shape_cast %55 : vector<2x8xf32> to vector<2x8x1xf32>
    %57 = vector.broadcast %56 : vector<2x8x1xf32> to vector<2x8x8xf32>
    %58 = arith.subf %54, %57 : vector<2x8x8xf32>
    %59 = math.exp %58 : vector<2x8x8xf32>
    %cst_17 = arith.constant dense<0.000000e+00> : vector<2x8xf32>
    %60 = vector.multi_reduction <add>, %59, %cst_17 [2] : vector<2x8x8xf32> to vector<2x8xf32>
    %61 = vector.shape_cast %60 : vector<2x8xf32> to vector<2x8x1xf32>
    %62 = tpu.reciprocal %61 : vector<2x8x1xf32> -> vector<2x8x1xf32>
    %63 = vector.broadcast %62 : vector<2x8x1xf32> to vector<2x8x8xf32>
    %64 = arith.mulf %59, %63 : vector<2x8x8xf32>
    "tpu.trace_start"() <{level = 10 : i32, message = "hts,hsd->htd"}> : () -> ()
    %cst_18 = arith.constant dense<0.000000e+00> : vector<2x8x16xf32>
    %65 = tpu.matmul %64, %45, %cst_18 {dimension_numbers = #tpu.dot_dimension_numbers<[2], [1], [1], [2], [0, 0, 0, 1, 1, 2], [0], [0]>} : vector<2x8x8xf32>, vector<2x8x16xf32>, vector<2x8x16xf32> -> vector<2x8x16xf32>
    "tpu.trace_stop"() : () -> ()
    %66 = vector.shape_cast %65 : vector<2x8x16xf32> to vector<1x2x8x16xf32>
    %67 = tpu.transpose %66, [0, 2, 1, 3] : vector<1x2x8x16xf32> -> vector<1x8x2x16xf32>
    %68 = vector.shape_cast %67 : vector<1x8x2x16xf32> to vector<8x32xf32>
    %c0_19 = arith.constant 0 : index
    %c0_20 = arith.constant 0 : index
    %69 = vector.load %arg6[%c0_19, %c0_20] : memref<32x32xf32, #tpu.memory_space<vmem>>, vector<32x32xf32>
    %cst_21 = arith.constant dense<0.000000e+00> : vector<8x32xf32>
    %70 = tpu.matmul %68, %69, %cst_21 {dimension_numbers = #tpu.dot_dimension_numbers<[1], [0], [0], [1], [0, 0, 1, 1], [], []>} : vector<8x32xf32>, vector<32x32xf32>, vector<8x32xf32> -> vector<8x32xf32>
    %c0_22 = arith.constant 0 : index
    %c0_23 = arith.constant 0 : index
    %71 = vector.load %arg7[%c0_22, %c0_23] : memref<1x32xf32, #tpu.memory_space<vmem>>, vector<1x32xf32>
    %72 = vector.shape_cast %71 : vector<1x32xf32> to vector<32xf32>
    %73 = vector.shape_cast %72 : vector<32xf32> to vector<1x32xf32>
    %74 = vector.broadcast %73 : vector<1x32xf32> to vector<8x32xf32>
    %75 = arith.addf %70, %74 : vector<8x32xf32>
    %76 = arith.addf %0, %75 : vector<8x32xf32>
    %cst_24 = arith.constant dense<0.000000e+00> : vector<8xf32>
    %77 = vector.multi_reduction <add>, %76, %cst_24 [1] : vector<8x32xf32> to vector<8xf32>
    %78 = vector.shape_cast %77 : vector<8xf32> to vector<8x1xf32>
    %cst_25 = arith.constant 3.200000e+01 : f32
    %79 = vector.broadcast %cst_25 : f32 to vector<8x1xf32>
    %80 = arith.divf %78, %79 : vector<8x1xf32>
    %81 = vector.broadcast %80 : vector<8x1xf32> to vector<8x32xf32>
    %82 = arith.subf %76, %81 : vector<8x32xf32>
    %83 = arith.mulf %82, %82 : vector<8x32xf32>
    %cst_26 = arith.constant dense<0.000000e+00> : vector<8xf32>
    %84 = vector.multi_reduction <add>, %83, %cst_26 [1] : vector<8x32xf32> to vector<8xf32>
    %85 = vector.shape_cast %84 : vector<8xf32> to vector<8x1xf32>
    %cst_27 = arith.constant 3.200000e+01 : f32
    %86 = vector.broadcast %cst_27 : f32 to vector<8x1xf32>
    %87 = arith.divf %85, %86 : vector<8x1xf32>
    %cst_28 = arith.constant 9.99999974E-6 : f32
    %88 = vector.broadcast %cst_28 : f32 to vector<8x1xf32>
    %89 = arith.addf %87, %88 : vector<8x1xf32>
    %90 = math.rsqrt %89 : vector<8x1xf32>
    %91 = vector.broadcast %90 : vector<8x1xf32> to vector<8x32xf32>
    %92 = arith.mulf %82, %91 : vector<8x32xf32>
    %c0_29 = arith.constant 0 : index
    %c0_30 = arith.constant 0 : index
    %93 = vector.load %arg8[%c0_29, %c0_30] : memref<1x32xf32, #tpu.memory_space<vmem>>, vector<1x32xf32>
    %94 = vector.shape_cast %93 : vector<1x32xf32> to vector<32xf32>
    %95 = vector.shape_cast %94 : vector<32xf32> to vector<1x32xf32>
    %96 = vector.broadcast %95 : vector<1x32xf32> to vector<8x32xf32>
    %97 = arith.mulf %92, %96 : vector<8x32xf32>
    %c0_31 = arith.constant 0 : index
    %c0_32 = arith.constant 0 : index
    %98 = vector.load %arg9[%c0_31, %c0_32] : memref<1x32xf32, #tpu.memory_space<vmem>>, vector<1x32xf32>
    %99 = vector.shape_cast %98 : vector<1x32xf32> to vector<32xf32>
    %100 = vector.shape_cast %99 : vector<32xf32> to vector<1x32xf32>
    %101 = vector.broadcast %100 : vector<1x32xf32> to vector<8x32xf32>
    %102 = arith.addf %97, %101 : vector<8x32xf32>
    %c0_33 = arith.constant 0 : index
    %c0_34 = arith.constant 0 : index
    %103 = vector.load %arg10[%c0_33, %c0_34] : memref<32x128xf32, #tpu.memory_space<vmem>>, vector<32x128xf32>
    %cst_35 = arith.constant dense<0.000000e+00> : vector<8x128xf32>
    %104 = tpu.matmul %102, %103, %cst_35 {dimension_numbers = #tpu.dot_dimension_numbers<[1], [0], [0], [1], [0, 0, 1, 1], [], []>} : vector<8x32xf32>, vector<32x128xf32>, vector<8x128xf32> -> vector<8x128xf32>
    %c0_36 = arith.constant 0 : index
    %c0_37 = arith.constant 0 : index
    %105 = vector.load %arg11[%c0_36, %c0_37] : memref<1x128xf32, #tpu.memory_space<vmem>>, vector<1x128xf32>
    %106 = vector.shape_cast %105 : vector<1x128xf32> to vector<128xf32>
    %107 = vector.shape_cast %106 : vector<128xf32> to vector<1x128xf32>
    %108 = vector.broadcast %107 : vector<1x128xf32> to vector<8x128xf32>
    %109 = arith.addf %104, %108 : vector<8x128xf32>
    %cst_38 = arith.constant 5.000000e-01 : f32
    %110 = vector.broadcast %cst_38 : f32 to vector<8x128xf32>
    %111 = arith.mulf %110, %109 : vector<8x128xf32>
    %cst_39 = arith.constant 0.707106769 : f32
    %112 = vector.broadcast %cst_39 : f32 to vector<8x128xf32>
    %113 = arith.mulf %109, %112 : vector<8x128xf32>
    %114 = math.erf %113 : vector<8x128xf32>
    %cst_40 = arith.constant 1.000000e+00 : f32
    %115 = vector.broadcast %cst_40 : f32 to vector<8x128xf32>
    %116 = arith.addf %115, %114 : vector<8x128xf32>
    %117 = arith.mulf %111, %116 : vector<8x128xf32>
    %c0_41 = arith.constant 0 : index
    %c0_42 = arith.constant 0 : index
    %118 = vector.load %arg12[%c0_41, %c0_42] : memref<128x32xf32, #tpu.memory_space<vmem>>, vector<128x32xf32>
    %cst_43 = arith.constant dense<0.000000e+00> : vector<8x32xf32>
    %119 = tpu.matmul %117, %118, %cst_43 {dimension_numbers = #tpu.dot_dimension_numbers<[1], [0], [0], [1], [0, 0, 1, 1], [], []>} : vector<8x128xf32>, vector<128x32xf32>, vector<8x32xf32> -> vector<8x32xf32>
    %c0_44 = arith.constant 0 : index
    %c0_45 = arith.constant 0 : index
    %120 = vector.load %arg13[%c0_44, %c0_45] : memref<1x32xf32, #tpu.memory_space<vmem>>, vector<1x32xf32>
    %121 = vector.shape_cast %120 : vector<1x32xf32> to vector<32xf32>
    %122 = vector.shape_cast %121 : vector<32xf32> to vector<1x32xf32>
    %123 = vector.broadcast %122 : vector<1x32xf32> to vector<8x32xf32>
    %124 = arith.addf %119, %123 : vector<8x32xf32>
    %125 = arith.addf %76, %124 : vector<8x32xf32>
    %c0_46 = arith.constant 0 : index
    %c0_47 = arith.constant 0 : index
    %126 = vector.load %arg14[%c0_46, %c0_47] : memref<8x32xf32, #tpu.memory_space<vmem>>, vector<8x32xf32>
    tpu.vector_store %arg14[%c0_46, %c0_47], %125 {strides = array<i32>} : memref<8x32xf32, #tpu.memory_space<vmem>>, vector<8x32xf32>,
    return
  }
  func.func @transform_0(%arg0: i32) -> (i32, i32) {
    %c0_i32 = arith.constant 0 : i32
    %c0_i32_0 = arith.constant 0 : i32
    return %arg0, %c0_i32 : i32, i32
  }
  func.func @transform_1(%arg0: i32) -> (i32, i32) {
    %c0_i32 = arith.constant 0 : i32
    %c0_i32_0 = arith.constant 0 : i32
    %c0_i32_1 = arith.constant 0 : i32
    return %c0_i32, %c0_i32_0 : i32, i32
  }
  func.func @transform_2(%arg0: i32) -> (i32, i32) {
    %c0_i32 = arith.constant 0 : i32
    %c0_i32_0 = arith.constant 0 : i32
    %c0_i32_1 = arith.constant 0 : i32
    return %c0_i32, %c0_i32_0 : i32, i32
  }
  func.func @transform_3(%arg0: i32) -> (i32, i32) {
    %c0_i32 = arith.constant 0 : i32
    %c0_i32_0 = arith.constant 0 : i32
    %c0_i32_1 = arith.constant 0 : i32
    return %c0_i32, %c0_i32_0 : i32, i32
  }
  func.func @transform_4(%arg0: i32) -> (i32, i32) {
    %c0_i32 = arith.constant 0 : i32
    %c0_i32_0 = arith.constant 0 : i32
    %c0_i32_1 = arith.constant 0 : i32
    return %c0_i32, %c0_i32_0 : i32, i32
  }
  func.func @transform_5(%arg0: i32) -> (i32, i32) {
    %c0_i32 = arith.constant 0 : i32
    %c0_i32_0 = arith.constant 0 : i32
    %c0_i32_1 = arith.constant 0 : i32
    return %c0_i32, %c0_i32_0 : i32, i32
  }
  func.func @transform_6(%arg0: i32) -> (i32, i32) {
    %c0_i32 = arith.constant 0 : i32
    %c0_i32_0 = arith.constant 0 : i32
    %c0_i32_1 = arith.constant 0 : i32
    return %c0_i32, %c0_i32_0 : i32, i32
  }
  func.func @transform_7(%arg0: i32) -> (i32, i32) {
    %c0_i32 = arith.constant 0 : i32
    %c0_i32_0 = arith.constant 0 : i32
    %c0_i32_1 = arith.constant 0 : i32
    return %c0_i32, %c0_i32_0 : i32, i32
  }
  func.func @transform_8(%arg0: i32) -> (i32, i32) {
    %c0_i32 = arith.constant 0 : i32
    %c0_i32_0 = arith.constant 0 : i32
    %c0_i32_1 = arith.constant 0 : i32
    return %c0_i32, %c0_i32_0 : i32, i32
  }
  func.func @transform_9(%arg0: i32) -> (i32, i32) {
    %c0_i32 = arith.constant 0 : i32
    %c0_i32_0 = arith.constant 0 : i32
    %c0_i32_1 = arith.constant 0 : i32
    return %c0_i32, %c0_i32_0 : i32, i32
  }
  func.func @transform_10(%arg0: i32) -> (i32, i32) {
    %c0_i32 = arith.constant 0 : i32
    %c0_i32_0 = arith.constant 0 : i32
    %c0_i32_1 = arith.constant 0 : i32
    return %c0_i32, %c0_i32_0 : i32, i32
  }
  func.func @transform_11(%arg0: i32) -> (i32, i32) {
    %c0_i32 = arith.constant 0 : i32
    %c0_i32_0 = arith.constant 0 : i32
    %c0_i32_1 = arith.constant 0 : i32
    return %c0_i32, %c0_i32_0 : i32, i32
  }
  func.func @transform_12(%arg0: i32) -> (i32, i32) {
    %c0_i32 = arith.constant 0 : i32
    %c0_i32_0 = arith.constant 0 : i32
    %c0_i32_1 = arith.constant 0 : i32
    return %c0_i32, %c0_i32_0 : i32, i32
  }
  func.func @transform_13(%arg0: i32) -> (i32, i32) {
    %c0_i32 = arith.constant 0 : i32
    %c0_i32_0 = arith.constant 0 : i32
    return %arg0, %c0_i32 : i32, i32
  }
}

</mosaic_0001>

<bundles_post_ra>
// kernel: tpu_custom_call.1
= control target key start
LH: loop header
LB: loop body
LE: loop exit
PB: predicated region body
PF: predicated region fallthrough
CT: control target
= control target key end

     0   :  { %s2509_s0 = inlined_call_operand.vmem [shape: f32[16,32], index: 0, kind: input, shape index: {}]   ;;  %s2510_s1 = inlined_call_operand.vmem [shape: f32[1,32], index: 1, kind: input, shape index: {}]   ;;  %s2511_s2 = inlined_call_operand.vmem [shape: f32[1,32], index: 2, kind: input, shape index: {}]   ;;  %s2512_s3 = inlined_call_operand.vmem [shape: f32[32,96], index: 3, kind: input, shape index: {}]   ;;  %s2513_s4 = inlined_call_operand.vmem [shape: f32[1,96], index: 4, kind: input, shape index: {}]   ;;  %s2514_s5 = inlined_call_operand.vmem [shape: f32[32,32], index: 5, kind: input, shape index: {}]   ;;  %s2515_s6 = inlined_call_operand.vmem [shape: f32[1,32], index: 6, kind: input, shape index: {}]   ;;  %s2516_s7 = inlined_call_operand.vmem [shape: f32[1,32], index: 7, kind: input, shape index: {}]   ;;  %s2517_s8 = inlined_call_operand.vmem [shape: f32[1,32], index: 8, kind: input, shape index: {}]   ;;  %s2518_s9 = inlined_call_operand.vmem [shape: f32[32,128], index: 9, kind: input, shape index: {}]   ;;  %s2519_s10 = inlined_call_operand.vmem [shape: f32[1,128], index: 10, kind: input, shape index: {}]   ;;  %s2520_s11 = inlined_call_operand.vmem [shape: f32[128,32], index: 11, kind: input, shape index: {}]   ;;  %s2521_s12 = inlined_call_operand.vmem [shape: f32[1,32], index: 12, kind: input, shape index: {}]   ;;  %s2522_s13 = inlined_call_operand.hbm [shape: f32[16,32], index: 13, kind: output, shape index: {}]  }
   0x1   :  { %2523 = sst [smem:[#allocation5_spill]] %s2509_s0 }
   0x2   :  { %2524 = sst [smem:[#allocation6_spill]] %s2510_s1 }
   0x3   :  { %2525 = sst [smem:[#allocation7_spill]] %s2511_s2 }
   0x4   :  { %18 = vsyncpa [#allocation3], 0 }
   0x5   :  { %20 = vsyncpa [#allocation3 + $0x1], 0  ;;  %s2150_s25 = smov 0   ;;  %s2152_s26 = smov 0  }
   0x6   :  { %s2154_s27 = smov 0   ;;  %s2156_s28 = smov 0  }
   0x7 LB: > { %s2171_s29 = sadd.s32 4294967295, %s2068_s28   ;;  %s1739_s30 = sadd.s32 4294967294, %s2068_s28   ;;  %s2068_s28 = sphi %s2156_s28, %s2534_s28   ;;  %s2064_s27 = sphi %s2154_s27, %s2533_s27   ;;  %s2060_s26 = sphi %s2152_s26, %s2532_s26   ;;  %s2056_s25 = sphi %s2150_s25, %s2531_s25  }
   0x8   : > { %s2175_s14 = sadd.s32 1, %s2068_s28   ;;  %s311_s15 = sadd.s32 1, %s2064_s27 }
   0x9   : > { %s308_s16 = ssub.s32 %s2068_s28, %s2175_s14  ;;  %p321_p0 = scmp.ne.s32.totalorder %s2064_s27, %s2060_s26 }
   0xa   : > { %p309_p1 = scmp.eq.s32.totalorder %s308_s16, 0  ;;  %p322_p2 = scmp.eq.s32.totalorder %s2171_s29, 1 }
   0xb   : > { %p327_p3 = scmp.ne.s32.totalorder %s2060_s26, %s2056_s25  ;;  %p328_p4 = scmp.eq.s32.totalorder %s1739_s30, 1 }
   0xc   : > { %s2186_s17 = scalar_select %p309_p1, %s2064_s27, %s311_s15  }
   0xd   : > { %p2188_p5 = por %p322_p2, %p321_p0  ;;  %p2192_p6 = por %p328_p4, %p327_p3 }
   0xe   : > { %p1742_p7 = scmp.ge.s32.totalorder %s2068_s28, 1  ;;  %p389_p8 = scmp.lt.s32.totalorder %s2068_s28, 3 }
  0x10   : > { %p390_p9 = pnand %p1742_p7, %p389_p8 }
  0x11   : > { %p432_p10 = scmp.lt.s32.totalorder (!%p390_p9), %s2171_s29, 1  ;;  %vm437_vm0 = vcmask (!%p390_p9), 261120   ;;  %s2528_s0 = sld [smem:[#allocation5_spill]] (!%p390_p9)  ;;  %v468_v7 = vld [vmem:[%s2512_s3] sm:$0xff] (!%p390_p9)  ;;  %v469_v8 = vld [vmem:[%s2512_s3 + $0x8] sm:$0xff] (!%p390_p9)  ;;  %v470_v9 = vld [vmem:[%s2512_s3 + $0x10] sm:$0xff] (!%p390_p9)  ;;  %v560_v31 = vlaneseq (!%p390_p9) }
  0x12   : > { %393 = sbr.rel (%p390_p9) target bundleno = 2685 (0xa7d), region = 72  ;;  %v2070_v10 = vmov (!%p390_p9), 0.0|0.0   ;;  %v1903_v11 = vpack.c.bf16 (!%p390_p9), %v469_v8, %v468_v7  ;;  %v471_v12 = vld [vmem:[%s2512_s3 + $0x18] sm:$0xff] (!%p390_p9)  ;;  %vm2071_vm1 = vmmov (!%p390_p9), 0   ;;  %v2072_v13 = vmov (!%p390_p9), 0.0   ;;  %s2529_s1 = sld [smem:[#allocation6_spill]] (!%p390_p9) }
  0x13   : > { %1902 = vmatprep.subr.bf16.mxu1 (!%p390_p9), %v2070_v10  ;;  %1822 = vmatprep.mubr.msk.f32.mxu1 (!%p390_p9), %vm2071_vm1, %v2072_v13  ;;  %v1906_v14 = vpack.c.bf16 (!%p390_p9), %v471_v12, %v470_v9  ;;  %s2530_s2 = sld [smem:[#allocation7_spill]] (!%p390_p9)  ;;  %v1747_v24 = vld [vmem:[%s2513_s4] ss:$0 sm:$0xff] (!%p390_p9)  ;;  %s2073_s23 = smov (!%p390_p9), 112   ;;  %v2075_v29 = vmov (!%p390_p9), 1983009808  }
  0x14   : > { %1835 = vmatprep.subr.mxu0 (!%p390_p9), %v2072_v13  ;;  %1837 = vmatprep.mubr.msk.f32.mxu0 (!%p390_p9), %vm2071_vm1, %v2072_v13  ;;  %v558_v30 = vunpack.c.l.s4 (!%p390_p9), %v2075_v29  ;;  %v2249_v33 = vshrl.u32 (!%p390_p9), %v560_v31, 7  ;;  %v2076_v37 = vmov (!%p390_p9), 1934713408   ;;  %vm921_vm2 = vcmask (!%p390_p9), 130048   ;;  %s2077_s30 = smov (!%p390_p9), 64   ;;  %s2078_s15 = smov (!%p390_p9), 16  }
  0x15   : > { %1904 = vmatpush3.bf16.msra.mxu1 (!%p390_p9), %v1903_v11  ;;  %v589_v38 = vunpack.c.l.s4 (!%p390_p9), %v2076_v37  ;;  %vm1078_vm4 = vcmask (!%p390_p9), 64512   ;;  %s429_s16 = sand.u32 (!%p390_p9), 1, %s2060_s26  }
  0x16   : > { %1905 = vmatprep.subr.bf16.mxu1 (!%p390_p9), %v2070_v10  ;;  %v559_v32 = vunpack.c.0.s8 (!%p390_p9), %v558_v30 }
  0x17   : > { %v590_v40 = vunpack.c.0.s8 (!%p390_p9), %v589_v38 }
  0x18   : > { %v1745_v19 = vld [vmem:[%s2529_s1] ss:$0 sm:$0xff] (!%p390_p9)  ;;  %v2256_v36 = vsub.s32 (!%p390_p9), %v559_v32, %v2249_v33 }
  0x19   : > { %s433_s20 = scalar_select %p432_p10, %s2171_s29, 1  ;;  %1907 = vmatpush3.bf16.msra.mxu1 %v1906_v14  ;;  %v1746_v21 = vld [vmem:[%s2530_s2] ss:$0 sm:$0xff]  ;;  %v2265_v47 = vsub.s32 %v590_v40, %v2249_v33 }
  0x1a   : > { %1825 = vmatprep.subr.mxu1 %v2072_v13 }
  0x1b   : > { %s1744_s21 = sshll.u32 %s433_s20, 3  ;;  %s1743_s20 = sshll.u32 %s429_s16, 3 }
  0x1c   : > { %s435_s24 = scalar_lea.vmem %s2528_s0, %s1744_s21  ;;  %s1771_s0 = sshll.u32 %s2171_s29, 7 }
  0x1d   : > { %v2203_v0 = vld [vmem:[%s435_s24] sm:$0xff]  ;;  %s2074_s24 = smov 96   ;;  %s431_s1 = scalar_lea.vmem [#allocation2], %s1743_s20 }
  0x1e   : > { %v438_v1 = vsel %vm437_vm0, %v2203_v0, 0.0  ;;  %s1667_s21 = scalar_lea.sflag [#allocation3], %s429_s16  ;;  %s2079_s20 = smov [#allocation2]  }
  0x1f   : > { %439 = vadd.xlane.f32.xlu0 %v438_v1  ;;  %s2010_s22 = sshll.u32 %s2079_s20, 4  ;;  %s2011_s22 = int_to_ptr.vmem [resolvable:$false] %s2010_s22 }
  0x20   : > { %s2012_s2 = scalar_lea.vmem %s2011_s22, 256 }
  0xac   : > { %v440_v2 = vpop.xlane.xlu0 %439 }
  0xad   : > { %v442_v3 = vmul.f32 0.03125, %v440_v2 }
  0xaf   : > { %v443_v4 = vsub.f32 %v2203_v0, %v442_v3 }
  0xb1   : > { %v444_v5 = vmul.f32 %v443_v4, %v443_v4 }
  0xb3   : > { %v445_v6 = vsel %vm437_vm0, %v444_v5, 0.0 }
  0xb4   : > { %446 = vadd.xlane.f32.xlu0 %v445_v6 }
 0x141   : > { %v447_v15 = vpop.xlane.xlu0 %446 }
 0x142   : > { %v448_v16 = vmul.f32 0.03125, %v447_v15 }
 0x144   : > { %v449_v17 = vadd.f32 1e-05, %v448_v16 }
 0x146   : > { %1992 = vrsqrt.f32 %v449_v17 }
 0x150   : > { %v1993_v18 = vpop.eup %1992 }
 0x151   : > { %v451_v20 = vmul.f32 %v1993_v18, %v443_v4 }
 0x153   : > { %v459_v22 = vmul.f32 %v1745_v19, %v451_v20 }
 0x155   : > { %v467_v23 = vadd.f32 %v1746_v21, %v459_v22 }
 0x157   : > { %1823 = vmatmul.mubr.msk.f32.vlgmr.msra.gmra.mrb[0].mxu1 %vm437_vm0, %v467_v23 }
 0x158   : > { %1827 = vmatprep.mubr.msk.f32.mxu1 %vm2071_vm1, %v2072_v13 }
 0x22a   : > { %v548_v25 = vpop.f32.mrb[0].mxu1 }
 0x22b   : > { %v2241_v26 = vadd.f32 %v1747_v24, %v548_v25  ;;  %v1824_v27 = vpop.f32.mrb[1].mxu1 }
 0x22d   : > { %553 = vrot.lane.b32.xlu1 %v2241_v26, %s2073_s23  ;;  %v556_v35 = vcombine.high %v2241_v26, %v2072_v13  ;;  %v563_v43 = vrot.slane %v2241_v26, %v2256_v36  ;;  %s1680_s23 = sshll.u32 %s431_s1, 4  ;;  %s2468_s23 = int_to_ptr.vmem [resolvable:$true] %s1680_s23 }
 0x22e   : > { %s2006_s29 = scalar_lea.vmem %s2468_s23, 128  ;;  %p2013_p0 = scmp.lt.s32.totalorder %s2468_s23, %s2011_s22 }
 0x22f   : > { %v570_v41 = vrot.slane %v556_v35, %v2256_v36  ;;  %p2007_p11 = scmp.ne.s32.totalorder %s2468_s23, %s2006_s29  ;;  %p2014_p1 = scmp.lt.s32.totalorder %s2012_s2, %s2006_s29 }
 0x231   : > { %672 = vrot.lane.b32.xlu1 %v2241_v26, %s2074_s24  ;;  %p2008_p12 = pnand %p2007_p11, %p2188_p5  ;;  %p2015_p2 = por %p2014_p1, %p2013_p0 }
 0x233   : > { %p2009_p13 = pneg %p2008_p12 }
 0x235   : > { %p2016_p3 = pnand %p2015_p2, %p2009_p13 }
 0x29f   : > { %v2245_v28 = vpop.permute.xlu1 %553 }
 0x2a0   : > { %674 = vrot.lane.b32.xlu0 %v2245_v28, %s2074_s24  ;;  %v571_v34 = vcombine.high %v2245_v28, %v2072_v13  ;;  %v578_v42 = vrot.slane %v2245_v28, %v2256_v36 }
 0x2a2   : > { %v585_v39 = vrot.slane %v571_v34, %v2256_v36  ;;  %v586_v48 = vcombine.low %v563_v43, %v578_v42  ;;  %v587_v49 = vcombine.high %v563_v43, %v578_v42 }
 0x2a3   : > { %v673_v46 = vpop.permute.xlu1 %672 }
 0x2a4   : > { %v602_v44 = vcombine.low %v570_v41, %v585_v39  ;;  %v603_v45 = vcombine.high %v570_v41, %v585_v39  ;;  %v678_v50 = vcombine.high %v673_v46, %v2072_v13  ;;  %v685_v54 = vrot.slane %v673_v46, %v2256_v36 }
 0x2a5   : > { %v594_v57 = vrot.slane %v586_v48, %v2265_v47  ;;  %v601_v58 = vrot.slane %v587_v49, %v2265_v47  ;;  %v919_v41 = vand.u32 127, %v560_v31 }
 0x2a6   : > { %v610_v51 = vrot.slane %v602_v44, %v2265_v47  ;;  %v617_v52 = vrot.slane %v603_v45, %v2265_v47  ;;  %v692_v59 = vrot.slane %v678_v50, %v2256_v36 }
 0x2a7   : > { %v622_v6 = vcombine.low %v594_v57, %v601_v58  ;;  %v1749_v7 = vcombine.high %v594_v57, %v601_v58  ;;  %vm920_vm3 = vcmp.le.s32.totalorder %v919_v41, %v2249_v33  ;;  %v1371_v41 = vld [vmem:[%s2514_s5 + $0x18] sm:$0xff] }
 0x2a8   : > { %v638_v63 = vcombine.low %v610_v51, %v617_v52  ;;  %v1750_v1 = vcombine.high %v610_v51, %v617_v52 }
 0x2a9   : > { %v629_v20 = vrot.slane %v622_v6, %v2256_v36  ;;  %v637_v21 = vrot.slane %v1749_v7, %v2256_v36 }
 0x2aa   : > { %v645_v14 = vrot.slane %v638_v63, %v2256_v36  ;;  %v653_v15 = vrot.slane %v1750_v1, %v2256_v36 }
 0x2ab   : > { %v654_v29 = vcombine.low %v629_v20, %v637_v21 }
 0x2ac   : > { %v662_v25 = vcombine.low %v645_v14, %v653_v15 }
 0x2ad   : > { %v661_v37 = vrot.slane %v654_v29, %v2265_v47 }
 0x2ae   : > { %v669_v34 = vrot.slane %v662_v25, %v2265_v47 }
 0x2b0   : > { %v670_v38 = vcombine.low %v661_v37, %v669_v34  ;;  %v671_v40 = vcombine.high %v661_v37, %v669_v34  ;;  %v1368_v37 = vld [vmem:[%s2514_s5] sm:$0xff] }
 0x312   : > { %v675_v53 = vpop.permute.xlu0 %674 }
 0x313   : > { %v693_v55 = vcombine.high %v675_v53, %v2072_v13  ;;  %v700_v56 = vrot.slane %v675_v53, %v2256_v36 }
 0x315   : > { %v707_v60 = vrot.slane %v693_v55, %v2256_v36  ;;  %v708_v61 = vcombine.low %v685_v54, %v700_v56  ;;  %v709_v62 = vcombine.high %v685_v54, %v700_v56 }
 0x317   : > { %v716_v2 = vrot.slane %v708_v61, %v2265_v47  ;;  %v723_v3 = vrot.slane %v709_v62, %v2265_v47  ;;  %v724_v4 = vcombine.low %v692_v59, %v707_v60  ;;  %v725_v5 = vcombine.high %v692_v59, %v707_v60 }
 0x319   : > { %v732_v8 = vrot.slane %v724_v4, %v2265_v47  ;;  %v739_v9 = vrot.slane %v725_v5, %v2265_v47  ;;  %v744_v11 = vcombine.low %v716_v2, %v723_v3  ;;  %v1751_v12 = vcombine.high %v716_v2, %v723_v3 }
 0x31b   : > { %v751_v16 = vrot.slane %v744_v11, %v2256_v36  ;;  %v759_v17 = vrot.slane %v1751_v12, %v2256_v36  ;;  %v760_v18 = vcombine.low %v732_v8, %v739_v9  ;;  %v1752_v19 = vcombine.high %v732_v8, %v739_v9 }
 0x31d   : > { %v767_v22 = vrot.slane %v760_v18, %v2256_v36  ;;  %v775_v23 = vrot.slane %v1752_v19, %v2256_v36  ;;  %v776_v24 = vcombine.low %v751_v16, %v759_v17 }
 0x31f   : > { %v784_v27 = vcombine.low %v767_v22, %v775_v23  ;;  %v783_v30 = vrot.slane %v776_v24, %v2265_v47 }
 0x321   : > { %v791_v32 = vrot.slane %v784_v27, %v2265_v47 }
 0x323   : > { %v792_v35 = vcombine.low %v783_v30, %v791_v32  ;;  %v793_v39 = vcombine.high %v783_v30, %v791_v32 }
 0x325   : > { %1826 = vmatpush3.xpose.msk.msra.mxu1 %vm921_vm2, %v792_v35 }
 0x326   : > { %1830 = vmatprep.subr.mxu1 %v2072_v13 }
 0x328   : > { %1828 = vmatmul.mubr.msk.f32.vlgmr.msra.gmra.mrb[2].mxu1 %vm921_vm2, %v670_v38  ;;  %v1369_v38 = vld [vmem:[%s2514_s5 + $0x8] sm:$0xff] }
 0x329   : > { %1831 = vmatpush3.xpose.msk.msra.mxu1 %vm921_vm2, %v793_v39  ;;  %1832 = vmatprep.mubr.msk.f32.mxu1 %vm2071_vm1, %v2072_v13  ;;  %v1370_v39 = vld [vmem:[%s2514_s5 + $0x10] sm:$0xff] }
 0x32a   : > { %1840 = vmatprep.subr.mxu1 %v2072_v13 }
 0x32c   : > { %1833 = vmatmul.mubr.msk.f32.vlgmr.msra.gmra.mrb[4].mxu1 %vm921_vm2, %v671_v40  ;;  %v1909_v40 = vpack.c.bf16 %v1369_v38, %v1368_v37  ;;  %v1575_v37 = vld [vmem:[%s2520_s11 + $0x20] sm:$0xff]  ;;  %v1576_v38 = vld [vmem:[%s2520_s11 + $0x28] sm:$0xff] }
 0x32d   : > { %1842 = vmatprep.mubr.msk.f32.mxu1 %vm2071_vm1, %v2072_v13 }
 0x3fb   : > { %v994_v42 = vpop.f32.mrb[2].mxu1 }
 0x3fc   : > { %v1076_v43 = vsel %vm920_vm3, %v994_v42, -inf  ;;  %v1829_v44 = vpop.f32.mrb[3].mxu1  ;;  %v1912_v42 = vpack.c.bf16 %v1371_v41, %v1370_v39  ;;  %v1927_v39 = vpack.c.bf16 %v1576_v38, %v1575_v37 }
 0x3fd   : > { %v1079_v45 = vsel %vm1078_vm4, %v1076_v43, -inf }
 0x3fe   : > { %1080 = vmax.xlane.f32.xlu1 %v1079_v45 }
 0x3ff   : > { %v1070_v46 = vpop.f32.mrb[4].mxu1 }
 0x400   : > { %v1077_v48 = vsel %vm920_vm3, %v1070_v46, -inf  ;;  %v1834_v49 = vpop.f32.mrb[5].mxu1 }
 0x401   : > { %v1082_v50 = vsel %vm1078_vm4, %v1077_v48, -inf }
 0x402   : > { %1083 = vmax.xlane.f32.xlu0 %v1082_v50 }
 0x418   : > { %796 = vrot.lane.b32.xlu0 %v2245_v28, %s2077_s30 }
 0x48b   : > { %v1081_v51 = vpop.xlane.xlu1 %1080 }
 0x48c   : > { %v1085_v31 = vsub.f32 %v1076_v43, %v1081_v51 }
 0x48e   : > { %v1087_v52 = vmul.f32 1.442695, %v1085_v31 }
 0x48f   : > { %v1084_v33 = vpop.xlane.xlu0 %1083 }
 0x490   : > { %1994 = vpow2.f32 %v1087_v52  ;;  %v1086_v53 = vsub.f32 %v1077_v48, %v1084_v33 }
 0x492   : > { %v1089_v54 = vmul.f32 1.442695, %v1086_v53 }
 0x493   : > { %v797_v28 = vpop.permute.xlu0 %796 }
 0x494   : > { %1996 = vpow2.f32 %v1089_v54  ;;  %v815_v61 = vcombine.high %v797_v28, %v2072_v13  ;;  %v822_v63 = vrot.slane %v797_v28, %v2256_v36 }
 0x496   : > { %v829_v3 = vrot.slane %v815_v61, %v2256_v36 }
 0x49a   : > { %v1995_v55 = vpop.eup %1994 }
 0x49b   : > { %v1091_v56 = vsel %vm1078_vm4, %v1995_v55, 0.0 }
 0x49c   : > { %1092 = vadd.xlane.f32.xlu1 %v1091_v56 }
 0x49e   : > { %v1997_v57 = vpop.eup %1996 }
 0x49f   : > { %v1094_v58 = vsel %vm1078_vm4, %v1997_v57, 0.0 }
 0x4a0   : > { %1095 = vadd.xlane.f32.xlu1 %v1094_v58 }
 0x4b1   : > { %794 = vrot.lane.b32.xlu1 %v2241_v26, %s2077_s30 }
 0x529   : > { %v1093_v59 = vpop.xlane.xlu1 %1092 }
 0x52a   : > { %1998 = vrcp.f32 %v1093_v59 }
 0x52d   : > { %v1096_v60 = vpop.xlane.xlu1 %1095 }
 0x52e   : > { %2000 = vrcp.f32 %v1096_v60 }
 0x531   : > { %v795_v62 = vpop.permute.xlu1 %794 }
 0x532   : > { %v800_v1 = vcombine.high %v795_v62, %v2072_v13  ;;  %v807_v2 = vrot.slane %v795_v62, %v2256_v36 }
 0x534   : > { %v814_v4 = vrot.slane %v800_v1, %v2256_v36  ;;  %v830_v5 = vcombine.low %v807_v2, %v822_v63  ;;  %v831_v6 = vcombine.high %v807_v2, %v822_v63  ;;  %v1999_v23 = vpop.eup %1998 }
 0x535   : > { %v1099_v35 = vmul.f32 %v1999_v23, %v1995_v55  ;;  %v1484_v23 = vld [vmem:[%s2518_s9 + $0x10] sm:$0xff] }
 0x536   : > { %v838_v26 = vrot.slane %v830_v5, %v2265_v47  ;;  %v845_v7 = vrot.slane %v831_v6, %v2265_v47  ;;  %v846_v8 = vcombine.low %v814_v4, %v829_v3  ;;  %v847_v9 = vcombine.high %v814_v4, %v829_v3 }
 0x538   : > { %v854_v11 = vrot.slane %v846_v8, %v2265_v47  ;;  %v861_v12 = vrot.slane %v847_v9, %v2265_v47  ;;  %v866_v14 = vcombine.low %v838_v26, %v845_v7  ;;  %v1753_v15 = vcombine.high %v838_v26, %v845_v7  ;;  %v2001_v25 = vpop.eup %2000 }
 0x539   : > { %v1100_v34 = vmul.f32 %v2001_v25, %v1997_v57 }
 0x53a   : > { %v873_v16 = vrot.slane %v866_v14, %v2256_v36  ;;  %v881_v17 = vrot.slane %v1753_v15, %v2256_v36  ;;  %v882_v18 = vcombine.low %v854_v11, %v861_v12  ;;  %v1754_v19 = vcombine.high %v854_v11, %v861_v12 }
 0x53c   : > { %v889_v20 = vrot.slane %v882_v18, %v2256_v36  ;;  %v897_v21 = vrot.slane %v1754_v19, %v2256_v36  ;;  %v898_v22 = vcombine.low %v873_v16, %v881_v17 }
 0x53e   : > { %v906_v24 = vcombine.low %v889_v20, %v897_v21  ;;  %v905_v27 = vrot.slane %v898_v22, %v2265_v47  ;;  %v1482_v21 = vld [vmem:[%s2518_s9] sm:$0xff] }
 0x540   : > { %v913_v29 = vrot.slane %v906_v24, %v2265_v47  ;;  %v1485_v24 = vld [vmem:[%s2518_s9 + $0x18] sm:$0xff] }
 0x541   : > { %v1918_v25 = vpack.c.bf16 %v1485_v24, %v1484_v23 }
 0x542   : > { %v914_v30 = vcombine.low %v905_v27, %v913_v29  ;;  %v915_v32 = vcombine.high %v905_v27, %v913_v29  ;;  %v1571_v27 = vld [vmem:[%s2520_s11] sm:$0xff]  ;;  %v1572_v29 = vld [vmem:[%s2520_s11 + $0x8] sm:$0xff] }
 0x544   : > { %1836 = vmatpush3.msra.mxu0 %v914_v30  ;;  %1841 = vmatpush3.msra.mxu1 %v915_v32  ;;  %v1573_v30 = vld [vmem:[%s2520_s11 + $0x10] sm:$0xff]  ;;  %v1921_v32 = vpack.c.bf16 %v1572_v29, %v1571_v27 }
 0x545   : > { %1838 = vmatmul.mubr.msk.f32.vlgmr.msra.gmra.mrb[0].mxu0 %vm1078_vm4, %v1099_v35  ;;  %1843 = vmatmul.mubr.msk.f32.vlgmr.msra.gmra.mrb[6].mxu1 %vm1078_vm4, %v1100_v34  ;;  %v1574_v34 = vld [vmem:[%s2520_s11 + $0x18] sm:$0xff] }
 0x546   : > { %1908 = vmatprep.subr.bf16.mxu1 %v2070_v10  ;;  %1853 = vmatprep.mubr.msk.f32.mxu1 %vm2071_vm1, %v2072_v13  ;;  %v1924_v35 = vpack.c.bf16 %v1574_v34, %v1573_v30 }
 0x547   : > { %1920 = vmatprep.subr.bf16.mxu0 %v2070_v10  ;;  %1899 = vmatprep.mubr.msk.f32.mxu0 %vm2071_vm1, %v2072_v13 }
 0x548   : > { %1910 = vmatpush3.bf16.msra.mxu1 %v1909_v40  ;;  %1922 = vmatpush3.bf16.msra.mxu0 %v1921_v32 }
 0x549   : > { %1911 = vmatprep.subr.bf16.mxu1 %v2070_v10  ;;  %1923 = vmatprep.subr.bf16.mxu0 %v2070_v10 }
 0x54c   : > { %1913 = vmatpush3.bf16.msra.mxu1 %v1912_v42  ;;  %1925 = vmatpush3.bf16.msra.mxu0 %v1924_v35 }
 0x54d   : > { %1914 = vmatprep.subr.bf16.mxu1 %v2070_v10  ;;  %1926 = vmatprep.subr.bf16.mxu0 %v2070_v10 }
 0x550   : > { %1928 = vmatpush3.bf16.msra.mxu0 %v1927_v39 }
 0x551   : > { %1929 = vmatprep.subr.bf16.mxu0 %v2070_v10 }
 0x618   : > { %v1170_v43 = vpop.f32.mrb[0].mxu0  ;;  %v1243_v44 = vpop.f32.mrb[6].mxu1 }
 0x619   : > { %v1247_v45 = vcombine.high %v1170_v43, %v2072_v13  ;;  %v1254_v46 = vrot.slane %v1170_v43, %v2256_v36  ;;  %v1262_v48 = vcombine.high %v1243_v44, %v2072_v13  ;;  %v1269_v49 = vrot.slane %v1243_v44, %v2256_v36  ;;  %v1839_v50 = vpop.f32.mrb[1].mxu0  ;;  %v1844_v51 = vpop.f32.mrb[7].mxu1  ;;  %v1765_v44 = vld [vmem:[%s2516_s7] ss:$0 sm:$0xff] }
 0x61a   : > { %v1577_v50 = vld [vmem:[%s2520_s11 + $0x30] sm:$0xff]  ;;  %v1578_v51 = vld [vmem:[%s2520_s11 + $0x38] sm:$0xff] }
 0x61b   : > { %v1261_v31 = vrot.slane %v1247_v45, %v2256_v36  ;;  %v1276_v52 = vrot.slane %v1262_v48, %v2256_v36  ;;  %v1277_v33 = vcombine.low %v1254_v46, %v1269_v49  ;;  %v1278_v53 = vcombine.high %v1254_v46, %v1269_v49  ;;  %v1766_v46 = vld [vmem:[%s2517_s8] ss:$0 sm:$0xff] }
 0x61d   : > { %v1285_v54 = vrot.slane %v1277_v33, %v2265_v47  ;;  %v1292_v55 = vrot.slane %v1278_v53, %v2265_v47  ;;  %v1293_v56 = vcombine.low %v1261_v31, %v1276_v52  ;;  %v1294_v57 = vcombine.high %v1261_v31, %v1276_v52  ;;  %v1579_v52 = vld [vmem:[%s2520_s11 + $0x40] sm:$0xff]  ;;  %v1580_v33 = vld [vmem:[%s2520_s11 + $0x48] sm:$0xff] }
 0x61e   : > { %v1930_v31 = vpack.c.bf16 %v1578_v51, %v1577_v50  ;;  %v1933_v53 = vpack.c.bf16 %v1580_v33, %v1579_v52 }
 0x61f   : > { %v1301_v58 = vrot.slane %v1293_v56, %v2265_v47  ;;  %v1308_v59 = vrot.slane %v1294_v57, %v2265_v47  ;;  %v1313_v28 = vcombine.low %v1285_v54, %v1292_v55  ;;  %v1761_v60 = vcombine.high %v1285_v54, %v1292_v55  ;;  %v1581_v54 = vld [vmem:[%s2520_s11 + $0x50] sm:$0xff]  ;;  %v1582_v55 = vld [vmem:[%s2520_s11 + $0x58] sm:$0xff]  ;;  %v1583_v57 = vld [vmem:[%s2520_s11 + $0x60] sm:$0xff] }
 0x620   : > { %1931 = vmatpush3.bf16.msra.mxu0 %v1930_v31  ;;  %v1936_v56 = vpack.c.bf16 %v1582_v55, %v1581_v54 }
 0x621   : > { %v1320_v61 = vrot.slane %v1313_v28, %v2256_v36  ;;  %v1328_v62 = vrot.slane %v1761_v60, %v2256_v36  ;;  %v1329_v63 = vcombine.low %v1301_v58, %v1308_v59  ;;  %v1762_v1 = vcombine.high %v1301_v58, %v1308_v59  ;;  %1932 = vmatprep.subr.bf16.mxu0 %v2070_v10  ;;  %v1584_v58 = vld [vmem:[%s2520_s11 + $0x68] sm:$0xff]  ;;  %v1585_v28 = vld [vmem:[%s2520_s11 + $0x70] sm:$0xff]  ;;  %v1586_v60 = vld [vmem:[%s2520_s11 + $0x78] sm:$0xff] }
 0x622   : > { %v1939_v59 = vpack.c.bf16 %v1584_v58, %v1583_v57 }
 0x623   : > { %v1336_v2 = vrot.slane %v1329_v63, %v2256_v36  ;;  %v1344_v3 = vrot.slane %v1762_v1, %v2256_v36  ;;  %v1345_v4 = vcombine.low %v1320_v61, %v1328_v62  ;;  %v1763_v36 = vld [vmem:[%s2515_s6] ss:$0 sm:$0xff]  ;;  %v1942_v61 = vpack.c.bf16 %v1586_v60, %v1585_v28 }
 0x624   : > { %1934 = vmatpush3.bf16.msra.mxu0 %v1933_v53  ;;  %v1767_v62 = vld [vmem:[%s2519_s10] ss:$0 sm:$0xff] }
 0x625   : > { %v1353_v5 = vcombine.low %v1336_v2, %v1344_v3  ;;  %v1352_v6 = vrot.slane %v1345_v4, %v2265_v47  ;;  %1935 = vmatprep.subr.bf16.mxu0 %v2070_v10 }
 0x627   : > { %v1360_v26 = vrot.slane %v1353_v5, %v2265_v47 }
 0x628   : > { %1937 = vmatpush3.bf16.msra.mxu0 %v1936_v56 }
 0x629   : > { %v1362_v7 = vcombine.high %v1352_v6, %v1360_v26  ;;  %v1361_v8 = vcombine.low %v1352_v6, %v1360_v26  ;;  %1938 = vmatprep.subr.bf16.mxu0 %v2070_v10  ;;  %v1769_v26 = vld [vmem:[%s2521_s12] ss:$0 sm:$0xff] }
 0x62b   : > { %1364 = vrot.lane.b32.xlu1 %v1362_v7, %s2078_s15  ;;  %s2466_s15 = scalar_lea.hbm %s2522_s13, %s1771_s0 }
 0x62c   : > { %1940 = vmatpush3.bf16.msra.mxu0 %v1939_v59 }
 0x62d   : > { %1941 = vmatprep.subr.bf16.mxu0 %v2070_v10 }
 0x630   : > { %1943 = vmatpush3.bf16.msra.mxu0 %v1942_v61 }
 0x69d   : > { %v1365_v9 = vpop.permute.xlu1 %1364 }
 0x69e   : > { %v1367_v11 = vsel %vm921_vm2, %v1361_v8, %v1365_v9 }
 0x69f   : > { %1854 = vmatmul.mubr.msk.f32.vlgmr.msra.gmra.mrb[8].mxu1 %vm437_vm0, %v1367_v11 }
 0x6a0   : > { %1864 = vmatprep.mubr.msk.f32.mxu1 %vm2071_vm1, %v2072_v13 }
 0x772   : > { %v1448_v12 = vpop.f32.mrb[8].mxu1 }
 0x773   : > { %v1449_v14 = vadd.f32 %v1763_v36, %v1448_v12  ;;  %v1855_v15 = vpop.f32.mrb[9].mxu1 }
 0x775   : > { %v2373_v47 = vadd.f32 %v1449_v14, %v2203_v0  ;;  %v1483_v0 = vld [vmem:[%s2518_s9 + $0x8] sm:$0xff] }
 0x776   : > { %v1915_v22 = vpack.c.bf16 %v1483_v0, %v1482_v21 }
 0x777   : > { %v1453_v16 = vsel %vm437_vm0, %v2373_v47, 0.0 }
 0x778   : > { %1454 = vadd.xlane.f32.xlu1 %v1453_v16  ;;  %1916 = vmatpush3.bf16.msra.mxu1 %v1915_v22 }
 0x779   : > { %1917 = vmatprep.subr.bf16.mxu1 %v2070_v10 }
 0x77c   : > { %1919 = vmatpush3.bf16.msra.mxu1 %v1918_v25 }
 0x805   : > { %v1455_v17 = vpop.xlane.xlu1 %1454 }
 0x806   : > { %v1456_v18 = vmul.f32 0.03125, %v1455_v17 }
 0x808   : > { %v1457_v19 = vsub.f32 %v2373_v47, %v1456_v18 }
 0x80a   : > { %v1458_v20 = vmul.f32 %v1457_v19, %v1457_v19 }
 0x80c   : > { %v1459_v13 = vsel %vm437_vm0, %v1458_v20, 0.0 }
 0x80d   : > { %1460 = vadd.xlane.f32.xlu0 %v1459_v13 }
 0x89a   : > { %v1461_v40 = vpop.xlane.xlu0 %1460 }
 0x89b   : > { %v1462_v41 = vmul.f32 0.03125, %v1461_v40 }
 0x89d   : > { %v1463_v42 = vadd.f32 1e-05, %v1462_v41 }
 0x89f   : > { %2002 = vrsqrt.f32 %v1463_v42 }
 0x8a9   : > { %v2003_v43 = vpop.eup %2002 }
 0x8aa   : > { %v1465_v45 = vmul.f32 %v2003_v43, %v1457_v19 }
 0x8ac   : > { %v1473_v48 = vmul.f32 %v1765_v44, %v1465_v45 }
 0x8ae   : > { %v1481_v49 = vadd.f32 %v1766_v46, %v1473_v48 }
 0x8b0   : > { %1865 = vmatmul.mubr.msk.f32.vlgmr.msra.gmra.mrb[10].mxu1 %vm437_vm0, %v1481_v49 }
 0x983   : > { %v1562_v63 = vpop.f32.mrb[10].mxu1 }
 0x984   : > { %v1563_v1 = vadd.f32 %v1767_v62, %v1562_v63  ;;  %v1866_v2 = vpop.f32.mrb[11].mxu1 }
 0x986   : > { %v1567_v10 = vmul.f32 0.70710677, %v1563_v1  ;;  %v1566_v4 = vmul.f32 0.5, %v1563_v1 }
 0x988   : > { %2004 = verf.f32 %v1567_v10 }
 0x992   : > { %v2005_v3 = vpop.eup %2004 }
 0x993   : > { %v1569_v5 = vadd.f32 1.0, %v2005_v3 }
 0x995   : > { %v1570_v6 = vmul.f32 %v1569_v5, %v1566_v4 }
 0x997   : > { %1900 = vmatmul.mubr.f32.vlgmr.msra.gmra.mrb[2].mxu0 %v1570_v6 }
 0xa6a   : > { %v1660_v7 = vpop.f32.mrb[2].mxu0 }
 0xa6b   : > { %v1661_v8 = vadd.f32 %v1769_v26, %v1660_v7  ;;  %v1901_v9 = vpop.f32.mrb[3].mxu0 }
 0xa6d   : > { %v1664_v11 = vadd.f32 %v1661_v8, %v2373_v47 }
 0xa6f   : > { %1665 = vst.msk [vmem:[%s431_s1] sm:$0xff] %vm437_vm0, %v1664_v11 }
 0xa70   : > { %2019 = shalt.err (!%p2016_p3)
}
 0xa71   : > { %s2020_s16 = scalar_lea.hbm %s2466_s15, 128  ;;  %s2024_s24 = scalar_lea.hbm %s2522_s13, 256 }
 0xa72   : > { %p2021_p4 = scmp.ne.s32.totalorder %s2466_s15, %s2020_s16  ;;  %p2025_p9 = scmp.lt.u32.totalorder %s2466_s15, %s2522_s13 }
 0xa73   : > { %p2026_p10 = scmp.lt.u32.totalorder %s2024_s24, %s2020_s16  ;;  %p2028_p12 = scmp.lt.u32.totalorder %s2020_s16, %s2466_s15 }
 0xa74   : > { %p2022_p7 = pnand %p2021_p4, %p2188_p5 }
 0xa75   : > { %p2027_p11 = por %p2026_p10, %p2025_p9 }
 0xa76   : > { %p2023_p8 = pneg %p2022_p7 }
 0xa77   : > { %p2029_p13 = por %p2028_p12, %p2027_p11 }
 0xa79   : > { %p2030_p0 = pnand %p2029_p13, %p2023_p8 }
 0xa7b   : > { %2033 = shalt.err (!%p2030_p0)
}
 0xa7c   : > { %1944 = dma.vmem_to_hbm [thread:$0]  (%p2188_p5), %s2468_s23, 128, %s2466_s15, %s1667_s21  }
 0xa7d PF: > { %p1950_p1 = scmp.ge.s32.totalorder %s2068_s28, 2  ;;  %s1692_s2 = sand.u32 1, %s2056_s25  }
 0xa7e   : > { %s1693_s29 = scalar_lea.sflag [#allocation3], %s1692_s2 }
 0xa7f   : > { %p1947_p2 = pnand %p1950_p1, %p2192_p6 }
 0xa81   : > { %2051 = dma.done.wait (!%p1947_p2), %s1693_s29, 128  }
 0xa82   : > { %2053 = vsyncadd (!%p1947_p2), %s1693_s29, 4294967168  ;;  %p23_p3 = scmp.ge.s32.totalorder %s2175_s14, 4   ;;  %s2531_s25 = smov %s2060_s26 }
 0xa83   : > { %s2532_s26 = smov %s2064_s27  ;;  %s2533_s27 = smov %s2186_s17 }
 0xa84   : > { %s2534_s28 = smov %s2175_s14  ;;  %25 = sbr.rel (!%p23_p3) target bundleno = 7 (0x7), region = 107 }
 0xa8b   :  { %1698 = vsyncpa [#allocation3], 1 }
 0xa8c   :  { %1700 = vsyncpa [#allocation3 + $0x1], 1 }

</bundles_post_ra>
